<compile_context>
chip_gen: v7x
topology: tpu7x:2x2x1
jax: 0.10.0
libtpu: 0.0.40
codegen_flags: <defaults>
</compile_context>

<pallas_src>
import functools
import re

import jax
import jax.numpy as jnp
from jax.experimental import pallas as pl
from jax.experimental.pallas import tpu as pltpu


def _round_up(x, m):
    return (x + m - 1) // m * m


def _largest_divisor(n, candidates):
    for c in candidates:
        if n % c == 0:
            return c
    return candidates[-1]


def _mxu_supports_int8():
    """True on generations with an int8 MXU path (v4/v5e/v5p/v6e); False on v7x+."""
    try:
        kind = jax.devices()[0].device_kind.lower()
    except Exception:
        return True
    m = re.search(r"v(\d+)", kind)
    if m is None:
        m = re.search(r"(\d+)", kind)
    if m is None:
        return True
    return int(m.group(1)) < 7


# ---------------------------------------------------------------------------
# Prepass: row-wise absmax quantization of the activations (done once per row,
# over the FULL K). On int8-MXU chips codes are emitted as int8; on v7x they
# are emitted as bf16 integer codes (exact in [-127, 127]) so the matmul kernel
# does not pay a per-element A-side cast on the VPU.
# ---------------------------------------------------------------------------
def _act_quant_kernel(x_ref, ca_ref, ascale_ref):
    x = x_ref[...].astype(jnp.float32)                          # (tm_q, Kp)
    absmax = jnp.max(jnp.abs(x), axis=-1, keepdims=True)        # (tm_q, 1)
    absmax = jnp.maximum(absmax, jnp.float32(1e-12))
    xq = jnp.clip(jnp.round(x * (127.0 / absmax)), -127.0, 127.0)
    ca_ref[...] = xq.astype(ca_ref.dtype)
    ascale_ref[...] = absmax * jnp.float32(1.0 / 127.0)         # SCA / 127


def _pick_prepass_tile(tm, Mp, Kp, x_itemsize, code_itemsize, budget_bytes=8 << 20):
    """Largest row tile (multiple of 32, divisor of Mp, <= tm) whose
    double-buffered (tile, full-K) in+out blocks fit the VMEM budget."""
    per_row = Kp * (x_itemsize + code_itemsize) + 8
    cands = sorted(
        {c for c in (512, 256, 128, 96, 64, 32, tm) if c <= tm and Mp % c == 0},
        reverse=True)
    for c in cands:
        if 2 * c * per_row <= budget_bytes:
            return c
    return cands[-1]


def _quantize_activations(x_p, tm_q, code_dtype):
    Mp, Kp = x_p.shape
    blk_bytes = tm_q * Kp * (x_p.dtype.itemsize
                             + jnp.dtype(code_dtype).itemsize) + tm_q * 4
    vmem_limit = int(min(64 << 20, max(16 << 20, 3 * blk_bytes)))
    return pl.pallas_call(
        _act_quant_kernel,
        out_shape=(
            jax.ShapeDtypeStruct((Mp, Kp), code_dtype),
            jax.ShapeDtypeStruct((Mp, 1), jnp.float32),
        ),
        grid=(Mp // tm_q,),
        in_specs=[pl.BlockSpec((tm_q, Kp), lambda i: (i, 0))],
        out_specs=(
            pl.BlockSpec((tm_q, Kp), lambda i: (i, 0)),
            pl.BlockSpec((tm_q, 1), lambda i: (i, 0)),
        ),
        compiler_params=pltpu.CompilerParams(
            dimension_semantics=("parallel",),
            vmem_limit_bytes=vmem_limit),
    )(x_p)


# ---------------------------------------------------------------------------
# Tiled matmul with K-axis accumulation and fused dequant + bias epilogue.
# ---------------------------------------------------------------------------
def _matmul_kernel(ca_ref, cbt_ref, ascale_ref, wscale_ref, bias_ref,
                   o_ref, acc_ref, *, use_int8):
    @pl.when(pl.program_id(2) == 0)
    def _():
        acc_ref[...] = jnp.zeros_like(acc_ref)

    if use_int8:
        # Native int8 x int8 -> int32 MXU path (v5e / v6e): bit-exact acc.
        acc_ref[...] += jnp.dot(ca_ref[...], cbt_ref[...],
                                preferred_element_type=jnp.int32)
    else:
        # v7x MXU has no int path. CA already arrives as bf16 integer codes
        # from the prepass; only the streamed weight tile is cast in-kernel.
        # TODO(synk): split-K into <=2^24-exact chunks if bitwise parity with
        # int32 accumulation is required for very large K on v7x.
        acc_ref[...] += jnp.dot(ca_ref[...],
                                cbt_ref[...].astype(jnp.bfloat16),
                                preferred_element_type=jnp.float32)

    @pl.when(pl.program_id(2) == pl.num_programs(2) - 1)
    def _():
        out = (acc_ref[...].astype(jnp.float32)
               * ascale_ref[...]            # (tm, 1)  = SCA/127
               * wscale_ref[...]            # (1, tn)  = SCB/127
               + bias_ref[...])             # (1, tn)
        o_ref[...] = out.astype(o_ref.dtype)


def _linear8bitlt_matmul(ca, cbt_p, a_scale, w_scale_p, bias_p, *,
                         out_dtype, tm, tn, tk, use_int8):
    Mp, Kp = ca.shape
    _, Np = cbt_p.shape
    acc_dtype = jnp.int32 if use_int8 else jnp.float32
    kernel = functools.partial(_matmul_kernel, use_int8=use_int8)

    # Double-buffered working set (inputs/output) + resident accumulator.
    a_bytes = tm * tk * ca.dtype.itemsize
    b_bytes = tk * tn                                   # int8 weights
    o_bytes = tm * tn * jnp.dtype(out_dtype).itemsize
    vmem_need = 2 * (a_bytes + b_bytes + o_bytes + 8 * tn + 4 * tm) + tm * tn * 4
    vmem_limit = int(min(64 << 20, max(16 << 20, 2 * vmem_need)))

    bytes_accessed = (Mp * Kp * ca.dtype.itemsize       # CA
                      + Kp * Np                         # CB^T int8
                      + Mp * Np * jnp.dtype(out_dtype).itemsize
                      + Mp * 4 + 2 * Np * 4)

    return pl.pallas_call(
        kernel,
        out_shape=jax.ShapeDtypeStruct((Mp, Np), out_dtype),
        grid_spec=pltpu.PrefetchScalarGridSpec(
            num_scalar_prefetch=0,
            grid=(Mp // tm, Np // tn, Kp // tk),
            in_specs=[
                pl.BlockSpec((tm, tk), lambda i, j, k: (i, k)),   # CA
                pl.BlockSpec((tk, tn), lambda i, j, k: (k, j)),   # CB^T
                pl.BlockSpec((tm, 1), lambda i, j, k: (i, 0)),    # SCA/127
                pl.BlockSpec((1, tn), lambda i, j, k: (0, j)),    # SCB/127
                pl.BlockSpec((1, tn), lambda i, j, k: (0, j)),    # bias
            ],
            out_specs=pl.BlockSpec((tm, tn), lambda i, j, k: (i, j)),
            scratch_shapes=[pltpu.VMEM((tm, tn), acc_dtype)],
        ),
        compiler_params=pltpu.CompilerParams(
            dimension_semantics=("parallel", "parallel", "arbitrary"),
            vmem_limit_bytes=vmem_limit),
        cost_estimate=pl.CostEstimate(
            flops=2 * Mp * Np * Kp,
            transcendentals=0,
            bytes_accessed=bytes_accessed),
    )(ca, cbt_p, a_scale, w_scale_p, bias_p)


# ---------------------------------------------------------------------------
# Offline weight quantization (Int8Params) + module wrapper.
# ---------------------------------------------------------------------------
def quantize_weight_rowwise(w):
    """bnb Int8Params row-wise quantization: CB (int8, [N,K]), SCB (absmax per row)."""
    absmax = jnp.max(jnp.abs(w), axis=-1)                 # (N,)
    absmax = jnp.maximum(absmax, 1e-12)
    cb = jnp.clip(jnp.round(w * (127.0 / absmax[:, None])), -127, 127).astype(jnp.int8)
    return cb, absmax.astype(jnp.float32)


class Linear8bitLt:
    """Inference forward of bnb Linear8bitLt (threshold=0, no outlier split).

    All weight-side preparation (quantize, transpose to CB^T, lane padding,
    scale/bias padding, tile selection for K/N) happens once at construction,
    so the per-call path is weight-traffic-optimal.
    """

    def __init__(self, weight, bias=None, use_int8=None):
        weight = jnp.asarray(weight)
        assert weight.ndim == 2
        self.out_features, self.in_features = weight.shape
        N, K = self.out_features, self.in_features

        # Int8Params: CB int8 codes + SCB per-row absmax.
        self.CB, self.SCB = quantize_weight_rowwise(weight)

        # Lane-dense tile sizes (depend only on N, K -> chosen offline).
        Np = _round_up(N, 128)
        Kp = _round_up(K, 128)
        self.tn = _largest_divisor(Np, (512, 256, 128))
        self.tk = _largest_divisor(Kp, (2048, 1024, 512, 256, 128))
        self.Np, self.Kp = Np, Kp

        # Pre-transposed, pre-padded weight (Kp, Np): no per-call transpose/pad.
        cbt = self.CB.T
        if (Kp, Np) != (K, N):
            cbt = jnp.pad(cbt, ((0, Kp - K), (0, Np - N)))
        self.cbt_p = cbt

        w_scale = (self.SCB.astype(jnp.float32) / 127.0).reshape(1, N)
        self.w_scale_p = (jnp.pad(w_scale, ((0, 0), (0, Np - N)))
                          if Np != N else w_scale)

        if bias is None:
            bias2d = jnp.zeros((1, N), jnp.float32)
        else:
            bias2d = jnp.asarray(bias, jnp.float32).reshape(1, N)
        self.bias_p = jnp.pad(bias2d, ((0, 0), (0, Np - N))) if Np != N else bias2d

        self.use_int8 = _mxu_supports_int8() if use_int8 is None else use_int8

    def __call__(self, x):
        K, N = self.in_features, self.out_features
        Kp, Np = self.Kp, self.Np
        orig_shape = x.shape
        x2d = x.reshape(-1, K)
        M = x2d.shape[0]

        code_dtype = jnp.int8 if self.use_int8 else jnp.bfloat16

        # M tile: single tile for decode-style shapes, 512 for large prefill.
        tm = min(512, _round_up(max(M, 1), 32))
        Mp = _round_up(M, tm)

        # v7x megacore: with a single M tile, keep >=2 steps on the parallel N
        # axis so both TensorCores have work (tn stays a divisor of Np).
        tn = self.tn
        if Mp // tm == 1:
            while Np // tn < 2 and tn >= 256:
                tn //= 2

        # Conditional activation padding: a no-op when M, K are tile-aligned.
        if (Mp, Kp) != (M, K):
            x2d = jnp.pad(x2d, ((0, Mp - M), (0, Kp - K)))

        # One-time activation quantization prepass (VMEM-bounded row tile,
        # decoupled from the matmul tm).
        tm_q = _pick_prepass_tile(tm, Mp, Kp, x.dtype.itemsize,
                                  jnp.dtype(code_dtype).itemsize)
        ca, a_scale = _quantize_activations(x2d, tm_q, code_dtype)

        out_p = _linear8bitlt_matmul(
            ca, self.cbt_p, a_scale, self.w_scale_p, self.bias_p,
            out_dtype=x.dtype, tm=tm, tn=tn, tk=self.tk,
            use_int8=self.use_int8)

        out = out_p[:M, :N]
        return out.reshape(*orig_shape[:-1], N)


# ---------------------------------------------------------------------------
# Pure-JAX reference of the LLM.int8() fast path (no outliers).
# ---------------------------------------------------------------------------
def reference(x, w, bias):
    cb, scb = quantize_weight_rowwise(w)
    absmax_x = jnp.maximum(jnp.max(jnp.abs(x), axis=-1, keepdims=True), 1e-12)
    xq = jnp.clip(jnp.round(x * (127.0 / absmax_x)), -127, 127)
    acc = xq @ cb.astype(jnp.float32).T
    return acc * (absmax_x / 127.0) * (scb[None, :] / 127.0) + bias[None, :]


if __name__ == "__main__":
    key = jax.random.PRNGKey(0)
    k_w, k_b, k_x = jax.random.split(key, 3)

    batch, seq, in_features, out_features = 2, 8, 32, 64

    # deterministic synthetic parameters (nn.Linear-style shapes)
    weight = jax.random.normal(k_w, (out_features, in_features), jnp.float32) * 0.1
    bias = jax.random.normal(k_b, (out_features,), jnp.float32) * 0.01
    x = jax.random.normal(k_x, (batch, seq, in_features), jnp.float32)

    layer = Linear8bitLt(weight, bias)   # offline quant + transpose + padding
    out = layer(x)
    out = jax.block_until_ready(out)

    ref = reference(x.reshape(-1, in_features), weight, bias).reshape(
        batch, seq, out_features)
    assert out.shape == (batch, seq, out_features)
    assert jnp.allclose(out, ref, atol=1e-4, rtol=1e-4), "mismatch vs reference"

    print("KERNEL_OK")
</pallas_src>

<mosaic_0001>
module attributes {stable_mosaic.version = 11 : i64} {
  func.func @_act_quant_kernel(%arg0: i32, %arg1: memref<32x128xf32, #tpu.memory_space<vmem>>, %arg2: memref<32x128xi8, #tpu.memory_space<vmem>>, %arg3: memref<32x1xf32, #tpu.memory_space<vmem>>) attributes {dimension_semantics = [#tpu.dimension_semantics<parallel>], iteration_bounds = array<i64: 1>, scalar_prefetch = 0 : i64, scratch_operands = 0 : i64, tpu.core_type = #tpu.core_type<tc>, window_params = [{transform_indices = @transform_0, window_bounds = array<i64: 32, 128>}, {transform_indices = @transform_1, window_bounds = array<i64: 32, 128>}, {transform_indices = @transform_2, window_bounds = array<i64: 32, 1>}]} {
    %c0 = arith.constant 0 : index
    %c0_0 = arith.constant 0 : index
    %0 = vector.load %arg1[%c0, %c0_0] : memref<32x128xf32, #tpu.memory_space<vmem>>, vector<32x128xf32>
    %1 = math.absf %0 : vector<32x128xf32>
    %cst = arith.constant dense<0xFF800000> : vector<32xf32>
    %2 = vector.multi_reduction <maximumf>, %1, %cst [1] : vector<32x128xf32> to vector<32xf32>
    %3 = vector.shape_cast %2 : vector<32xf32> to vector<32x1xf32>
    %cst_1 = arith.constant 9.99999996E-13 : f32
    %4 = vector.broadcast %cst_1 : f32 to vector<32x1xf32>
    %5 = arith.maximumf %3, %4 : vector<32x1xf32>
    %cst_2 = arith.constant 1.270000e+02 : f32
    %6 = vector.broadcast %cst_2 : f32 to vector<32x1xf32>
    %7 = arith.divf %6, %5 : vector<32x1xf32>
    %8 = vector.broadcast %7 : vector<32x1xf32> to vector<32x128xf32>
    %9 = arith.mulf %0, %8 : vector<32x128xf32>
    %10 = math.roundeven %9 : vector<32x128xf32>
    %cst_3 = arith.constant -1.270000e+02 : f32
    %cst_4 = arith.constant 1.270000e+02 : f32
    %11 = vector.broadcast %cst_3 : f32 to vector<32x128xf32>
    %12 = arith.maximumf %11, %10 : vector<32x128xf32>
    %13 = vector.broadcast %cst_4 : f32 to vector<32x128xf32>
    %14 = arith.minimumf %13, %12 : vector<32x128xf32>
    %15 = arith.fptosi %14 : vector<32x128xf32> to vector<32x128xi8>
    %c0_5 = arith.constant 0 : index
    %c0_6 = arith.constant 0 : index
    %16 = vector.load %arg2[%c0_5, %c0_6] : memref<32x128xi8, #tpu.memory_space<vmem>>, vector<32x128xi8>
    tpu.vector_store %arg2[%c0_5, %c0_6], %15 {strides = array<i32>} : memref<32x128xi8, #tpu.memory_space<vmem>>, vector<32x128xi8>,
    %cst_7 = arith.constant 0.00787401571 : f32
    %17 = vector.broadcast %cst_7 : f32 to vector<32x1xf32>
    %18 = arith.mulf %5, %17 : vector<32x1xf32>
    %c0_8 = arith.constant 0 : index
    %c0_9 = arith.constant 0 : index
    %19 = vector.load %arg3[%c0_8, %c0_9] : memref<32x1xf32, #tpu.memory_space<vmem>>, vector<32x1xf32>
    tpu.vector_store %arg3[%c0_8, %c0_9], %18 {strides = array<i32>} : memref<32x1xf32, #tpu.memory_space<vmem>>, vector<32x1xf32>,
    return
  }
  func.func @transform_0(%arg0: i32) -> (i32, i32) {
    %c0_i32 = arith.constant 0 : i32
    %c0_i32_0 = arith.constant 0 : i32
    return %arg0, %c0_i32 : i32, i32
  }
  func.func @transform_1(%arg0: i32) -> (i32, i32) {
    %c0_i32 = arith.constant 0 : i32
    %c0_i32_0 = arith.constant 0 : i32
    return %arg0, %c0_i32 : i32, i32
  }
  func.func @transform_2(%arg0: i32) -> (i32, i32) {
    %c0_i32 = arith.constant 0 : i32
    %c0_i32_0 = arith.constant 0 : i32
    return %arg0, %c0_i32 : i32, i32
  }
}

</mosaic_0001>

<bundles_post_ra>
// kernel: tpu_custom_call.1
= control target key start
LH: loop header
LB: loop body
LE: loop exit
PB: predicated region body
PF: predicated region fallthrough
CT: control target
= control target key end

     0   :  { %8 = vsyncpa [#allocation3], 0  ;;  %s239_s0 = inlined_call_operand.hbm [shape: f32[32,128], index: 0, kind: input, shape index: {}]   ;;  %s240_s1 = inlined_call_operand.hbm [shape: s8[32,128], index: 1, kind: output, shape index: {0}]   ;;  %s241_s2 = inlined_call_operand.vmem [shape: f32[32,1], index: 2, kind: output, shape index: {1}]  }
   0x1   :  { %9 = vsyncpa [#allocation4], 0  ;;  %s180_s9 = smov [#allocation2]   ;;  %s132_s13 = scalar_lea.hbm %s239_s0, 512 }
   0x2   :  { %s15_s10 = sshll.u32 %s180_s9, 4  ;;  %p133_p0 = scmp.ne.s32.totalorder %s239_s0, %s132_s13  ;;  %s16_s10 = int_to_ptr.vmem [resolvable:$true] %s15_s10 }
   0x3   :  { %p136_p1 = scmp.lt.u32.totalorder %s132_s13, %s239_s0 }
   0x5   :  { %p138_p2 = pnand %p136_p1, %p133_p0 }
   0x7   :  { %141 = shalt.err (!%p138_p2)
}
   0x8   :  { %s142_s18 = scalar_lea.vmem %s16_s10, 512  ;;  %p147_p4 = scmp.lt.s32.totalorder %s16_s10, %s16_s10 }
   0x9   :  { %p143_p3 = scmp.ne.s32.totalorder %s16_s10, %s142_s18  ;;  %p148_p5 = scmp.lt.s32.totalorder %s142_s18, %s142_s18 }
   0xb   :  { %p149_p6 = por %p148_p5, %p147_p4 }
   0xd   :  { %p150_p7 = pnand %p149_p6, %p143_p3 }
   0xf   :  { %153 = shalt.err (!%p150_p7)
}
  0x10   :  { %s181_s19 = smov 128   ;;  %s182_s20 = smov 8  }
  0x11   :  { %21 = dma.hbm_to_vmem [thread:$0]  %s239_s0, 512, %s16_s10, [#allocation3], %s181_s19, %s181_s19, %s182_s20  }
  0x12   :  { %176 = dma.done.wait [#allocation3], 512  }
  0x13   :  { %177 = vsyncadd [#allocation3], 4294966784  ;;  %v27_v0 = vld [vmem:[#allocation2 + $0x10] sm:$0xff]  ;;  %v25_v1 = vld [vmem:[#allocation2] sm:$0xff]  ;;  %vm88_vm0 = vcmask 7168  }
  0x14   :  { %v28_v2 = vld [vmem:[#allocation2 + $0x18] sm:$0xff]  ;;  %v31_v3 = vand.u32 2147483647, %v27_v0  ;;  %v29_v4 = vand.u32 2147483647, %v25_v1  ;;  %v26_v5 = vld [vmem:[#allocation2 + $0x8] sm:$0xff] }
  0x15   :  { %v32_v6 = vand.u32 2147483647, %v28_v2  ;;  %v30_v7 = vand.u32 2147483647, %v26_v5 }
  0x16   :  { %37 = vmax.xlane.f32.xlu1 %v31_v3  ;;  %33 = vmax.xlane.f32.xlu0 %v29_v4 }
  0x1a   :  { %39 = vmax.xlane.f32.xlu1 %v32_v6  ;;  %35 = vmax.xlane.f32.xlu0 %v30_v7 }
  0xa3   :  { %v38_v8 = vpop.xlane.xlu1 %37  ;;  %v34_v9 = vpop.xlane.xlu0 %33 }
  0xa4   :  { %v43_v10 = vmax.f32 %v38_v8, 1e-12  ;;  %v41_v11 = vmax.f32 %v34_v9, 1e-12 }
  0xa6   :  { %124 = vrcp.f32 %v43_v10  ;;  %v86_v12 = vmul.f32 0.007874016, %v43_v10  ;;  %v84_v13 = vmul.f32 0.007874016, %v41_v11 }
  0xa7   :  { %126 = vrcp.f32 %v41_v11  ;;  %v40_v14 = vpop.xlane.xlu1 %39  ;;  %v36_v15 = vpop.xlane.xlu0 %35 }
  0xa8   :  { %91 = vst.msk [vmem:[%s241_s2 + $0x10] sm:$0xff] %vm88_vm0, %v86_v12  ;;  %89 = vst.msk [vmem:[%s241_s2] sm:$0xff] %vm88_vm0, %v84_v13  ;;  %v44_v16 = vmax.f32 %v40_v14, 1e-12  ;;  %v42_v17 = vmax.f32 %v36_v15, 1e-12 }
  0xaa   :  { %128 = vrcp.f32 %v44_v16  ;;  %v87_v18 = vmul.f32 0.007874016, %v44_v16  ;;  %v85_v19 = vmul.f32 0.007874016, %v42_v17 }
  0xab   :  { %130 = vrcp.f32 %v42_v17 }
  0xac   :  { %92 = vst.msk [vmem:[%s241_s2 + $0x18] sm:$0xff] %vm88_vm0, %v87_v18  ;;  %90 = vst.msk [vmem:[%s241_s2 + $0x8] sm:$0xff] %vm88_vm0, %v85_v19  ;;  %s183_s2 = smov [#allocation5]  }
  0xad   :  { %s99_s30 = sshll.u32 %s183_s2, 4  ;;  %s100_s30 = int_to_ptr.vmem [resolvable:$true] %s99_s30 }
  0xae   :  { %s154_s3 = scalar_lea.vmem %s100_s30, 128  ;;  %p159_p9 = scmp.lt.s32.totalorder %s100_s30, %s100_s30 }
  0xaf   :  { %p155_p8 = scmp.ne.s32.totalorder %s100_s30, %s154_s3  ;;  %p160_p10 = scmp.lt.s32.totalorder %s154_s3, %s154_s3 }
  0xb0   :  { %v125_v20 = vpop.eup %124 }
  0xb1   :  { %v127_v21 = vpop.eup %126  ;;  %v50_v22 = vmul.f32 127.0, %v125_v20  ;;  %p161_p11 = por %p160_p10, %p159_p9 }
  0xb2   :  { %v46_v23 = vmul.f32 127.0, %v127_v21 }
  0xb3   :  { %v55_v24 = vmul.f32 %v50_v22, %v27_v0  ;;  %p162_p12 = pnand %p161_p11, %p155_p8 }
  0xb4   :  { %v129_v25 = vpop.eup %128  ;;  %v53_v26 = vmul.f32 %v46_v23, %v25_v1 }
  0xb5   :  { %v131_v27 = vpop.eup %130  ;;  %v118_v28 = vround.rtne.f32 %v55_v24  ;;  %v52_v29 = vmul.f32 127.0, %v129_v25 }
  0xb6   :  { %v116_v30 = vround.rtne.f32 %v53_v26  ;;  %v48_v31 = vmul.f32 127.0, %v131_v27 }
  0xb7   :  { %v56_v32 = vmul.f32 %v52_v29, %v28_v2  ;;  %v114_v35 = vclamps-f32 %v118_v28, 127.0 }
  0xb8   :  { %v54_v33 = vmul.f32 %v48_v31, %v26_v5  ;;  %v112_v37 = vclamps-f32 %v116_v30, 127.0 }
  0xb9   :  { %v119_v34 = vround.rtne.f32 %v56_v32  ;;  %v71_v40 = vtrunc.f32 %v114_v35 }
  0xba   :  { %v117_v36 = vround.rtne.f32 %v54_v33  ;;  %v69_v42 = vtrunc.f32 %v112_v37 }
  0xbb   :  { %v115_v38 = vclamps-f32 %v119_v34, 127.0 }
  0xbc   :  { %v113_v39 = vclamps-f32 %v117_v36, 127.0 }
  0xbd   :  { %v72_v41 = vtrunc.f32 %v115_v38 }
  0xbe   :  { %v70_v43 = vtrunc.f32 %v113_v39 }
  0xbf   :  { %v77_v44 = vpack.c.f32.eXmY %v71_v40, %v72_v41, 312 }
  0xc0   :  { %v73_v45 = vpack.c.f32.eXmY %v69_v42, %v70_v43, 312 }
  0xc2   :  { %v81_v46 = vpack.c.b8 %v77_v44, %v73_v45 }
  0xc4   :  { %83 = vst [vmem:[#allocation5] sm:$0xff] %v81_v46 }
  0xc5   :  { %165 = shalt.err (!%p162_p12)
}
  0xc6   :  { %s166_s6 = scalar_lea.hbm %s240_s1, 128 }
  0xc7   :  { %p167_p13 = scmp.ne.s32.totalorder %s240_s1, %s166_s6  ;;  %p170_p0 = scmp.lt.u32.totalorder %s166_s6, %s240_s1 }
  0xc9   :  { %p172_p1 = pnand %p170_p0, %p167_p13 }
  0xcb   :  { %175 = shalt.err (!%p172_p1)
}
  0xcc   :  { %102 = dma.vmem_to_hbm [thread:$0]  %s100_s30, 128, %s240_s1, [#allocation4]  }
  0xcd   :  { %178 = dma.done.wait [#allocation4], 128  }
  0xce   :  { %179 = vsyncadd [#allocation4], 4294967168 }
  0xcf   :  { %110 = vsyncpa [#allocation3], 1 }
  0xd0   :  { %111 = vsyncpa [#allocation4], 1 }

</bundles_post_ra>
